<compile_context>
chip_gen: v5e
topology: v5e:2x2
jax: 0.10.0
libtpu: 0.0.40
codegen_flags: <defaults>
</compile_context>

<pallas_src>
import functools

import jax
import jax.numpy as jnp
from jax.experimental import pallas as pl
from jax.experimental.pallas import tpu as pltpu


def _round_up(v, m):
    return (v + m - 1) // m * m


def _nonlocal_attn_kernel(x_ref, phi_t_ref, g_ref, theta_w_ref, theta_b_ref,
                          w_w_ref, w_b_ref, out_ref, *, mxu_dtype):
    """One grid step = (batch element b, token tile n).

    x_ref:      (1, tN, Cp)   tokens, mxu_dtype
    phi_t_ref:  (1, Cip, Nsp) pooled phi, transposed, mxu_dtype
    g_ref:      (1, Nsp, Cip) pooled g, mxu_dtype
    weights:    theta_w (Cp, Cip) / w_w (Cip, Cp) in mxu_dtype, biases f32
    """
    x_tile = x_ref[0]                                               # (tN, Cp)

    # theta 1x1 conv; the 1/Ns attention normalization is pre-folded into
    # theta_w / theta_b in the wrapper.
    theta = (jnp.dot(x_tile, theta_w_ref[...],
                     preferred_element_type=jnp.float32)
             + theta_b_ref[...])                                    # (tN, Cip) f32

    # attention: f = theta @ phi^T (padded Ns columns of phi^T are zero, so the
    # padding is exact), then y = f @ g (padded g rows are zero).
    f = jnp.dot(theta.astype(mxu_dtype), phi_t_ref[0],
                preferred_element_type=jnp.float32)                 # (tN, Nsp)
    y = jnp.dot(f.astype(mxu_dtype), g_ref[0],
                preferred_element_type=jnp.float32)                 # (tN, Cip)

    # W 1x1 conv with BatchNorm (inference form) pre-folded into w_w / w_b.
    w_y = (jnp.dot(y.astype(mxu_dtype), w_w_ref[...],
                   preferred_element_type=jnp.float32)
           + w_b_ref[...])                                          # (tN, Cp)

    # residual add in natural token order.
    out_ref[0] = (w_y + x_tile.astype(jnp.float32)).astype(out_ref.dtype)


def nonlocal_block_nd(x, params, downsample_stride=2, tile_n=256,
                      mxu_dtype=jnp.float32, out_dtype=None):
    B, C, H, W = x.shape
    s = downsample_stride
    assert H % s == 0 and W % s == 0
    assert tile_n % 8 == 0
    Hs, Ws = H // s, W // s
    N, Ns = H * W, Hs * Ws
    Ci = params["theta_w"].shape[1]
    if out_dtype is None:
        out_dtype = x.dtype

    LANE = 128
    Cp, Cip = _round_up(C, LANE), _round_up(Ci, LANE)
    Nsp = _round_up(Ns, LANE)
    f32 = jnp.float32

    # Token tile: pad N up to a multiple of the tile (padded rows are stripped
    # after the call); never shrink the tile below an 8-aligned full extent.
    tN = tile_n if N >= tile_n else _round_up(N, 8)
    Np = _round_up(N, tN)

    def pad2(a, rows, cols):
        a = jnp.asarray(a, f32)
        return jnp.pad(a, ((0, rows - a.shape[0]), (0, cols - a.shape[1])))

    # Fold the 1/Ns attention normalization into the theta conv (linear).
    theta_w = (pad2(params["theta_w"], Cp, Cip) / Ns).astype(mxu_dtype)
    theta_b = pad2(params["theta_b"], 1, Cip) / Ns                   # f32 bias

    # Fuse the phi and g 1x1 convs into one (C, 2*Cip) weight for the pre-pass.
    pg_w = jnp.concatenate([pad2(params["phi_w"], C, Cip),
                            pad2(params["g_w"], C, Cip)], axis=1)    # (C, 2Cip)
    pg_b = jnp.concatenate([pad2(params["phi_b"], 1, Cip),
                            pad2(params["g_b"], 1, Cip)], axis=1)    # (1, 2Cip)

    # Fold BatchNorm (inference / running stats) into the W conv.
    bn_scale = params["bn_gamma"] * jax.lax.rsqrt(params["bn_var"] + 1e-5)
    w_w = pad2(params["w_w"] * bn_scale, Cip, Cp).astype(mxu_dtype)
    w_b = pad2((params["w_b"] - params["bn_mean"]) * bn_scale
               + params["bn_beta"], 1, Cp)                           # f32 bias

    # Channels-last tokens (natural row-major order).
    x_hw = jnp.transpose(x, (0, 2, 3, 1)).astype(f32)                # (B,H,W,C)

    # ---- pooled phi/g pre-pass (tiny; plain XLA) ---------------------------
    # maxpool(conv1x1(x)) == window-max over per-member convs; bias hoisted
    # out of the max (max(a+b, c+b) == max(a,c)+b).
    x_win = x_hw.reshape(B, Hs, s, Ws, s, C)
    pooled = (jnp.max(jnp.einsum("bhpwqc,cd->bhpwqd", x_win, pg_w), axis=(2, 4))
              + pg_b)                                                # (B,Hs,Ws,2Cip)
    pooled = pooled.reshape(B, Ns, 2 * Cip)
    phi_t = jnp.transpose(pooled[:, :, :Cip], (0, 2, 1))             # (B,Cip,Ns)
    phi_t = jnp.pad(phi_t, ((0, 0), (0, 0), (0, Nsp - Ns))).astype(mxu_dtype)
    g_mat = jnp.pad(pooled[:, :, Cip:],
                    ((0, 0), (0, Nsp - Ns), (0, 0))).astype(mxu_dtype)

    # ---- main kernel inputs -------------------------------------------------
    x_tok = x_hw.reshape(B, N, C)
    x_tok = jnp.pad(x_tok, ((0, 0), (0, Np - N), (0, Cp - C))).astype(mxu_dtype)

    grid = (B, Np // tN)
    kernel = functools.partial(_nonlocal_attn_kernel, mxu_dtype=mxu_dtype)

    mxu_bytes = jnp.dtype(mxu_dtype).itemsize
    out_bytes = jnp.dtype(out_dtype).itemsize
    cost = pl.CostEstimate(
        flops=2 * B * Np * (2 * Cp * Cip + 2 * Nsp * Cip),
        transcendentals=0,
        bytes_accessed=(B * Np * Cp * (mxu_bytes + out_bytes)
                        + 2 * B * Nsp * Cip * mxu_bytes
                        + 2 * Cp * Cip * mxu_bytes))

    # Generation-aware VMEM limit (~3/4 of physical, capped at 100 MiB).
    try:
        vmem_cap = int(pltpu.get_tpu_info().vmem_capacity_bytes)
    except Exception:
        vmem_cap = 128 * 1024 * 1024
    vmem_limit = min((vmem_cap * 3) // 4, 100 * 1024 * 1024)

    out = pl.pallas_call(
        kernel,
        out_shape=jax.ShapeDtypeStruct((B, Np, Cp), out_dtype),
        grid=grid,
        in_specs=[
            pl.BlockSpec((1, tN, Cp), lambda b, n: (b, n, 0)),     # x tokens
            pl.BlockSpec((1, Cip, Nsp), lambda b, n: (b, 0, 0)),   # phi^T
            pl.BlockSpec((1, Nsp, Cip), lambda b, n: (b, 0, 0)),   # g
            pl.BlockSpec((Cp, Cip), lambda b, n: (0, 0)),          # theta_w
            pl.BlockSpec((1, Cip), lambda b, n: (0, 0)),           # theta_b
            pl.BlockSpec((Cip, Cp), lambda b, n: (0, 0)),          # w_w
            pl.BlockSpec((1, Cp), lambda b, n: (0, 0)),            # w_b
        ],
        out_specs=pl.BlockSpec((1, tN, Cp), lambda b, n: (b, n, 0)),
        compiler_params=pltpu.CompilerParams(
            dimension_semantics=("parallel", "parallel"),
            vmem_limit_bytes=vmem_limit),
        cost_estimate=cost,
    )(x_tok, phi_t, g_mat, theta_w, theta_b, w_w, w_b)

    # Strip token / channel padding, back to NCHW.
    out = out[:, :N, :C].reshape(B, H, W, C).astype(x.dtype)
    return jnp.transpose(out, (0, 3, 1, 2))


def nonlocal_ref(x, p):
    """Pure-JAX reference of the PyTorch forward (eval-mode BN)."""
    B, C, H, W = x.shape
    Ci = p["theta_w"].shape[1]

    def conv1x1(inp, w, b):                # inp NCHW, w (Cin, Cout), b (1, Cout)
        return jnp.einsum("bchw,co->bohw", inp, w) + b[0][None, :, None, None]

    def pool(inp):
        return jax.lax.reduce_window(inp, -jnp.inf, jax.lax.max,
                                     (1, 1, 2, 2), (1, 1, 2, 2), "VALID")

    g_x = pool(conv1x1(x, p["g_w"], p["g_b"])).reshape(B, Ci, -1)
    g_x = jnp.transpose(g_x, (0, 2, 1))                            # (B, Ns, Ci)
    theta_x = conv1x1(x, p["theta_w"], p["theta_b"]).reshape(B, Ci, -1)
    theta_x = jnp.transpose(theta_x, (0, 2, 1))                    # (B, N, Ci)
    phi_x = pool(conv1x1(x, p["phi_w"], p["phi_b"])).reshape(B, Ci, -1)

    f = jnp.einsum("bnc,bcm->bnm", theta_x, phi_x)
    f = f / f.shape[-1]
    y = jnp.einsum("bnm,bmc->bnc", f, g_x)                         # (B, N, Ci)
    y = jnp.transpose(y, (0, 2, 1)).reshape(B, Ci, H, W)

    w_y = conv1x1(y, p["w_w"], p["w_b"])
    inv_std = jax.lax.rsqrt(p["bn_var"][0] + 1e-5)
    w_y = ((w_y - p["bn_mean"][0][None, :, None, None])
           * inv_std[None, :, None, None]
           * p["bn_gamma"][0][None, :, None, None]
           + p["bn_beta"][0][None, :, None, None])
    return w_y + x


if __name__ == "__main__":
    B, C, H, W = 2, 4, 16, 16
    Ci = C // 2                                    # inter_channels = in_channels // 2

    key = jax.random.PRNGKey(0)
    keys = jax.random.split(key, 13)

    params = {
        # conv weights stored as (Cin, Cout) so that tokens @ W == 1x1 conv
        "theta_w": 0.1 * jax.random.normal(keys[1], (C, Ci), jnp.float32),
        "theta_b": 0.1 * jax.random.normal(keys[2], (1, Ci), jnp.float32),
        "phi_w":   0.1 * jax.random.normal(keys[3], (C, Ci), jnp.float32),
        "phi_b":   0.1 * jax.random.normal(keys[4], (1, Ci), jnp.float32),
        "g_w":     0.1 * jax.random.normal(keys[5], (C, Ci), jnp.float32),
        "g_b":     0.1 * jax.random.normal(keys[6], (1, Ci), jnp.float32),
        "w_w":     0.1 * jax.random.normal(keys[7], (Ci, C), jnp.float32),
        "w_b":     0.1 * jax.random.normal(keys[8], (1, C), jnp.float32),
        # Nonzero BN params/stats to verify the folded-BN path (the torch
        # module inits gamma=beta=0, which is a strict subset of this test).
        "bn_gamma": 1.0 + 0.1 * jax.random.normal(keys[9], (1, C), jnp.float32),
        "bn_beta":  0.1 * jax.random.normal(keys[10], (1, C), jnp.float32),
        "bn_mean":  0.1 * jax.random.normal(keys[11], (1, C), jnp.float32),
        "bn_var":   1.0 + 0.1 * jax.random.uniform(keys[12], (1, C), jnp.float32),
    }

    x = jax.random.normal(keys[0], (B, C, H, W), jnp.float32)

    z_ref = nonlocal_ref(x, params)

    # Exact path (f32 MXU operands, f32 output).
    z = jax.block_until_ready(nonlocal_block_nd(x, params, mxu_dtype=jnp.float32))
    assert z.shape == x.shape == z_ref.shape
    assert jnp.allclose(z, z_ref, atol=1e-4, rtol=1e-4), "f32 mismatch vs reference"

    # bf16 end-to-end MXU path (perf configuration for v5e/v6e/v7x);
    # bf16 output halves writeback; looser tolerance.
    z_bf16 = jax.block_until_ready(
        nonlocal_block_nd(x, params, mxu_dtype=jnp.bfloat16,
                          out_dtype=jnp.bfloat16))
    assert jnp.allclose(z_bf16, z_ref, atol=5e-2, rtol=5e-2), "bf16 mismatch vs reference"

    print("KERNEL_OK")
</pallas_src>

<mosaic_0001>
module attributes {stable_mosaic.version = 11 : i64} {
  func.func @_nonlocal_attn_kernel(%arg0: i32, %arg1: i32, %arg2: memref<1x256x128xf32, #tpu.memory_space<vmem>>, %arg3: memref<1x128x128xf32, #tpu.memory_space<vmem>>, %arg4: memref<1x128x128xf32, #tpu.memory_space<vmem>>, %arg5: memref<128x128xf32, #tpu.memory_space<vmem>>, %arg6: memref<1x128xf32, #tpu.memory_space<vmem>>, %arg7: memref<128x128xf32, #tpu.memory_space<vmem>>, %arg8: memref<1x128xf32, #tpu.memory_space<vmem>>, %arg9: memref<1x256x128xf32, #tpu.memory_space<vmem>>) attributes {dimension_semantics = [#tpu.dimension_semantics<parallel>, #tpu.dimension_semantics<parallel>], iteration_bounds = array<i64: 2, 1>, scalar_prefetch = 0 : i64, scratch_operands = 0 : i64, tpu.core_type = #tpu.core_type<tc>, window_params = [{transform_indices = @transform_0, window_bounds = array<i64: 1, 256, 128>}, {transform_indices = @transform_1, window_bounds = array<i64: 1, 128, 128>}, {transform_indices = @transform_2, window_bounds = array<i64: 1, 128, 128>}, {pipeline_mode = #tpu.pipeline_mode<synchronous>, transform_indices = @transform_3, window_bounds = array<i64: 128, 128>}, {pipeline_mode = #tpu.pipeline_mode<synchronous>, transform_indices = @transform_4, window_bounds = array<i64: 1, 128>}, {pipeline_mode = #tpu.pipeline_mode<synchronous>, transform_indices = @transform_5, window_bounds = array<i64: 128, 128>}, {pipeline_mode = #tpu.pipeline_mode<synchronous>, transform_indices = @transform_6, window_bounds = array<i64: 1, 128>}, {transform_indices = @transform_7, window_bounds = array<i64: 1, 256, 128>}]} {
    %c0 = arith.constant 0 : index
    %c0_0 = arith.constant 0 : index
    %c0_1 = arith.constant 0 : index
    %0 = vector.load %arg2[%c0, %c0_0, %c0_1] : memref<1x256x128xf32, #tpu.memory_space<vmem>>, vector<1x256x128xf32>
    %1 = vector.shape_cast %0 : vector<1x256x128xf32> to vector<256x128xf32>
    %c0_2 = arith.constant 0 : index
    %c0_3 = arith.constant 0 : index
    %2 = vector.load %arg5[%c0_2, %c0_3] : memref<128x128xf32, #tpu.memory_space<vmem>>, vector<128x128xf32>
    %cst = arith.constant dense<0.000000e+00> : vector<256x128xf32>
    %3 = tpu.matmul %1, %2, %cst {dimension_numbers = #tpu.dot_dimension_numbers<[1], [0], [0], [1], [0, 0, 1, 1], [], []>} : vector<256x128xf32>, vector<128x128xf32>, vector<256x128xf32> -> vector<256x128xf32>
    %c0_4 = arith.constant 0 : index
    %c0_5 = arith.constant 0 : index
    %4 = vector.load %arg6[%c0_4, %c0_5] : memref<1x128xf32, #tpu.memory_space<vmem>>, vector<1x128xf32>
    %5 = vector.broadcast %4 : vector<1x128xf32> to vector<256x128xf32>
    %6 = arith.addf %3, %5 : vector<256x128xf32>
    %c0_6 = arith.constant 0 : index
    %c0_7 = arith.constant 0 : index
    %c0_8 = arith.constant 0 : index
    %7 = vector.load %arg3[%c0_6, %c0_7, %c0_8] : memref<1x128x128xf32, #tpu.memory_space<vmem>>, vector<1x128x128xf32>
    %8 = vector.shape_cast %7 : vector<1x128x128xf32> to vector<128x128xf32>
    %cst_9 = arith.constant dense<0.000000e+00> : vector<256x128xf32>
    %9 = tpu.matmul %6, %8, %cst_9 {dimension_numbers = #tpu.dot_dimension_numbers<[1], [0], [0], [1], [0, 0, 1, 1], [], []>} : vector<256x128xf32>, vector<128x128xf32>, vector<256x128xf32> -> vector<256x128xf32>
    %c0_10 = arith.constant 0 : index
    %c0_11 = arith.constant 0 : index
    %c0_12 = arith.constant 0 : index
    %10 = vector.load %arg4[%c0_10, %c0_11, %c0_12] : memref<1x128x128xf32, #tpu.memory_space<vmem>>, vector<1x128x128xf32>
    %11 = vector.shape_cast %10 : vector<1x128x128xf32> to vector<128x128xf32>
    %cst_13 = arith.constant dense<0.000000e+00> : vector<256x128xf32>
    %12 = tpu.matmul %9, %11, %cst_13 {dimension_numbers = #tpu.dot_dimension_numbers<[1], [0], [0], [1], [0, 0, 1, 1], [], []>} : vector<256x128xf32>, vector<128x128xf32>, vector<256x128xf32> -> vector<256x128xf32>
    %c0_14 = arith.constant 0 : index
    %c0_15 = arith.constant 0 : index
    %13 = vector.load %arg7[%c0_14, %c0_15] : memref<128x128xf32, #tpu.memory_space<vmem>>, vector<128x128xf32>
    %cst_16 = arith.constant dense<0.000000e+00> : vector<256x128xf32>
    %14 = tpu.matmul %12, %13, %cst_16 {dimension_numbers = #tpu.dot_dimension_numbers<[1], [0], [0], [1], [0, 0, 1, 1], [], []>} : vector<256x128xf32>, vector<128x128xf32>, vector<256x128xf32> -> vector<256x128xf32>
    %c0_17 = arith.constant 0 : index
    %c0_18 = arith.constant 0 : index
    %15 = vector.load %arg8[%c0_17, %c0_18] : memref<1x128xf32, #tpu.memory_space<vmem>>, vector<1x128xf32>
    %16 = vector.broadcast %15 : vector<1x128xf32> to vector<256x128xf32>
    %17 = arith.addf %14, %16 : vector<256x128xf32>
    %18 = arith.addf %17, %1 : vector<256x128xf32>
    %c0_19 = arith.constant 0 : index
    %c0_20 = arith.constant 0 : index
    %c0_21 = arith.constant 0 : index
    %19 = vector.load %arg9[%c0_19, %c0_20, %c0_21] : memref<1x256x128xf32, #tpu.memory_space<vmem>>, vector<1x256x128xf32>
    %20 = vector.shape_cast %19 : vector<1x256x128xf32> to vector<256x128xf32>
    %21 = vector.shape_cast %18 : vector<256x128xf32> to vector<1x256x128xf32>
    tpu.vector_store %arg9[%c0_19, %c0_20, %c0_21], %21 {strides = array<i32>} : memref<1x256x128xf32, #tpu.memory_space<vmem>>, vector<1x256x128xf32>,
    return
  }
  func.func @transform_0(%arg0: i32, %arg1: i32) -> (i32, i32, i32) {
    %c0_i32 = arith.constant 0 : i32
    %c0_i32_0 = arith.constant 0 : i32
    return %arg0, %arg1, %c0_i32 : i32, i32, i32
  }
  func.func @transform_1(%arg0: i32, %arg1: i32) -> (i32, i32, i32) {
    %c0_i32 = arith.constant 0 : i32
    %c0_i32_0 = arith.constant 0 : i32
    %c0_i32_1 = arith.constant 0 : i32
    return %arg0, %c0_i32, %c0_i32_0 : i32, i32, i32
  }
  func.func @transform_2(%arg0: i32, %arg1: i32) -> (i32, i32, i32) {
    %c0_i32 = arith.constant 0 : i32
    %c0_i32_0 = arith.constant 0 : i32
    %c0_i32_1 = arith.constant 0 : i32
    return %arg0, %c0_i32, %c0_i32_0 : i32, i32, i32
  }
  func.func @transform_3(%arg0: i32, %arg1: i32) -> (i32, i32) {
    %c0_i32 = arith.constant 0 : i32
    %c0_i32_0 = arith.constant 0 : i32
    %c0_i32_1 = arith.constant 0 : i32
    return %c0_i32, %c0_i32_0 : i32, i32
  }
  func.func @transform_4(%arg0: i32, %arg1: i32) -> (i32, i32) {
    %c0_i32 = arith.constant 0 : i32
    %c0_i32_0 = arith.constant 0 : i32
    %c0_i32_1 = arith.constant 0 : i32
    return %c0_i32, %c0_i32_0 : i32, i32
  }
  func.func @transform_5(%arg0: i32, %arg1: i32) -> (i32, i32) {
    %c0_i32 = arith.constant 0 : i32
    %c0_i32_0 = arith.constant 0 : i32
    %c0_i32_1 = arith.constant 0 : i32
    return %c0_i32, %c0_i32_0 : i32, i32
  }
  func.func @transform_6(%arg0: i32, %arg1: i32) -> (i32, i32) {
    %c0_i32 = arith.constant 0 : i32
    %c0_i32_0 = arith.constant 0 : i32
    %c0_i32_1 = arith.constant 0 : i32
    return %c0_i32, %c0_i32_0 : i32, i32
  }
  func.func @transform_7(%arg0: i32, %arg1: i32) -> (i32, i32, i32) {
    %c0_i32 = arith.constant 0 : i32
    %c0_i32_0 = arith.constant 0 : i32
    return %arg0, %arg1, %c0_i32 : i32, i32, i32
  }
}

</mosaic_0001>

<bundles_post_ra>
// kernel: tpu_custom_call.1
= control target key start
LH: loop header
LB: loop body
LE: loop exit
PB: predicated region body
PF: predicated region fallthrough
CT: control target
= control target key end

     0   :  { %s2143_s0 = inlined_call_operand.hbm [shape: f32[2,256,128], index: 0, kind: input, shape index: {}]   ;;  %s2144_s1 = inlined_call_operand.hbm [shape: f32[2,128,128], index: 1, kind: input, shape index: {}]   ;;  %s2145_s2 = inlined_call_operand.hbm [shape: f32[2,128,128], index: 2, kind: input, shape index: {}]   ;;  %s2146_s3 = inlined_call_operand.hbm [shape: f32[128,128], index: 3, kind: input, shape index: {}]   ;;  %s2147_s4 = inlined_call_operand.vmem [shape: f32[1,128], index: 4, kind: input, shape index: {}]   ;;  %s2148_s5 = inlined_call_operand.hbm [shape: f32[128,128], index: 5, kind: input, shape index: {}]   ;;  %s2149_s6 = inlined_call_operand.vmem [shape: f32[1,128], index: 6, kind: input, shape index: {}]   ;;  %s2150_s7 = inlined_call_operand.hbm [shape: f32[2,256,128], index: 7, kind: output, shape index: {}]  }
   0x1   :  { %2164 = sst [smem:[#allocation24_spill]] %s2144_s1 }
   0x2   :  { %2165 = sst [smem:[#allocation25_spill]] %s2146_s3 }
   0x3   :  { %2166 = sst [smem:[#allocation26_spill]] %s2150_s7 }
   0x4   :  { %12 = vsyncpa [#allocation3], 0 }
   0x5   :  { %14 = vsyncpa [#allocation3 + $0x1], 0 }
   0x6   :  { %15 = vsyncpa [#allocation6], 0 }
   0x7   :  { %17 = vsyncpa [#allocation6 + $0x1], 0 }
   0x8   :  { %18 = vsyncpa [#allocation9], 0 }
   0x9   :  { %19 = vsyncpa [#allocation4], 0 }
   0xa   :  { %21 = vsyncpa [#allocation4 + $0x1], 0  ;;  %s1638_s24 = smov 0   ;;  %s1640_s25 = smov 0  }
   0xb   :  { %s1642_s26 = smov 0   ;;  %s1644_s27 = smov 0  }
   0xc   :  { %s1646_s28 = smov 0   ;;  %s1648_s29 = smov 0  }
   0xd LB: > { %2167 = sst [smem:[#allocation16_spill]] %s1570_s24  ;;  %s1669_s30 = sadd.s32 4294967295, %s1590_s29   ;;  %s1590_s29 = sphi %s1648_s29, %s27_s29   ;;  %s1586_s28 = sphi %s1646_s28, %s2198_s28   ;;  %s1582_s27 = sphi %s1644_s27, %s2197_s27   ;;  %s1578_s26 = sphi %s1642_s26, %s2193_s26   ;;  %s1574_s25 = sphi %s1640_s25, %s2196_s25   ;;  %s1570_s24 = sphi %s1638_s24, %s2195_s24  }
   0xe   : > { %2168 = sst [smem:[#allocation17_spill]] %s1578_s26  ;;  %s1221_s8 = sadd.s32 4294967294, %s1590_s29  }
   0xf   : > { %2169 = sst [smem:[#allocation18_spill]] %s1582_s27  ;;  %p61_p0 = scmp.ne.s32.totalorder %s1574_s25, %s1570_s24 }
  0x10   : > { %2170 = sst [smem:[#allocation19_spill]] %s1590_s29  ;;  %p62_p1 = scmp.eq.s32.totalorder %s1669_s30, 0 }
  0x11   : > { %p223_p2 = scmp.eq.s32.totalorder %s1669_s30, 1  ;;  %p229_p3 = scmp.eq.s32.totalorder %s1221_s8, 1 }
  0x12   : > { %p1678_p4 = por %p62_p1, %p61_p0  ;;  %p1222_p5 = scmp.ge.s32.totalorder %s1590_s29, 1 }
  0x13   : > { %p1683_p6 = por %p229_p3, %p61_p0  ;;  %p236_p7 = scmp.lt.s32.totalorder %s1590_s29, 3 }
  0x14   : > { %s2174_s3 = sld [smem:[#allocation25_spill]]  ;;  %s1592_s15 = smov [#allocation8]  }
  0x15   : > { %s2172_s10 = scalar_select %p1683_p6, 1, 0 }
  0x16   : > { %p1691_p8 = pnand %p1222_p5, %p236_p7  ;;  %s249_s16 = sshll.u32 %s1592_s15, 4  ;;  %s250_s16 = int_to_ptr.vmem [resolvable:$true] %s249_s16 }
  0x17   : > { %2173 = sst [smem:[#allocation20_spill]] %s2172_s10  ;;  %s2151_s18 = smov 128  }
  0x18   : > { %p1267_p9 = pneg %p1691_p8  ;;  %s2153_s19 = smov 8  }
  0x19   : > { %s39_s20 = sadd.s32 1, %s1586_s28  ;;  %s48_s21 = sadd.s32 1, %s1578_s26 }
  0x1a   : > { %s247_s13 = sshll.u32 %s2174_s3, 4  ;;  %p1699_p10 = pnand %p1267_p9, %p62_p1  ;;  %s248_s13 = int_to_ptr.hbm [resolvable:$true] %s247_s13 }
  0x1b   : > { %p41_p12 = scmp.ge.s32.totalorder %s39_s20, 2  ;;  %p55_p13 = scmp.ne.s32.totalorder %s1578_s26, %s1574_s25 }
  0x1c   : > { %1270 = dma.hbm_to_vmem [thread:$0]  (!%p1699_p10), %s248_s13, 2048, %s250_s16, [#allocation9], %s2151_s18, %s2151_s18, %s2153_s19  }
  0x1d   : > { %p56_p0 = scmp.eq.s32.totalorder %s1590_s29, 0  ;;  %s2200_s20 = smov (%p41_p12, %s39_s20), 0 }
  0x1e   : > { %2177 = sst [smem:[#allocation21_spill]] %s2200_s20  ;;  %p1718_p5 = por %p223_p2, %p55_p13 }
  0x1f   : > { %p57_p3 = por %p56_p0, %p55_p13  ;;  %s43_s23 = ssub.s32 %s1586_s28, %s2200_s20 }
  0x20   : > { %s2178_s22 = scalar_select %p1718_p5, 1, 0 }
  0x21   : > { %p1290_p7 = scmp.lt.s32.totalorder %s1590_s29, 2  ;;  %p46_p9 = scmp.eq.s32.totalorder %s43_s23, 0 }
  0x22   : > { %2179 = sst [smem:[#allocation22_spill]] %s2178_s22  ;;  %s1726_s8 = sand.u32 1, %s1578_s26  }
  0x23   : > { %p1728_p11 = pnand %p1290_p7, %p57_p3  ;;  %s307_s12 = sand.u32 1, %s1590_s29  }
  0x24   : > { %s1734_s13 = scalar_select %p46_p9, %s1578_s26, %s48_s21  }
  0x25   : > { %s1229_s15 = sshll.u32 %s1726_s8, 7  ;;  %s1248_s16 = sshll.u32 %s1586_s28, 7 }
  0x26   : > { %2181 = sst [smem:[#allocation23_spill]] %s1734_s13  ;;  %s311_s10 = scalar_lea.vmem [#allocation5], %s1229_s15 }
  0x27   : > { %s2182_s1 = sld [smem:[#allocation24_spill]]  ;;  %s319_s23 = sshll.u32 %s311_s10, 4  ;;  %s320_s23 = int_to_ptr.vmem [resolvable:$true] %s319_s23 }
  0x28   : > { %s308_s24 = scalar_lea.sflag [#allocation6], %s307_s12  ;;  %s2183_s22 = smov 8  }
  0x29   : > { %s2184_s29 = smov 128   ;;  %s338_s26 = scalar_lea.hbm %s2145_s2, %s1248_s16 }
  0x2a   : > { %s339_s18 = sshll.u32 %s338_s26, 4  ;;  %s333_s19 = scalar_lea.vmem [#allocation7], %s1229_s15  ;;  %s340_s18 = int_to_ptr.hbm [resolvable:$true] %s339_s18 }
  0x2b   : > { %s264_s12 = sshll.u32 %s2148_s5, 4  ;;  %s1595_s7 = smov [#allocation10]   ;;  %s265_s12 = int_to_ptr.hbm [resolvable:$true] %s264_s12 }
  0x2c   : > { %s266_s27 = sshll.u32 %s1595_s7, 4  ;;  %s1226_s26 = sshll.u32 %s1726_s8, 8  ;;  %s267_s27 = int_to_ptr.vmem [resolvable:$true] %s266_s27 }
  0x2d   : > { %s316_s3 = scalar_lea.hbm %s2182_s1, %s1248_s16  ;;  %s287_s1 = scalar_lea.vmem [#allocation2], %s1226_s26 }
  0x2e   : > { %s317_s20 = sshll.u32 %s316_s3, 4  ;;  %s341_s3 = sshll.u32 %s333_s19, 4  ;;  %s318_s20 = int_to_ptr.hbm [resolvable:$true] %s317_s20  ;;  %s342_s3 = int_to_ptr.vmem [resolvable:$true] %s341_s3 }
  0x2f   : > { %1280 = dma.hbm_to_vmem [thread:$0]  (!%p1728_p11), %s318_s20, 2048, %s320_s23, %s308_s24, %s2184_s29, %s2184_s29, %s2183_s22  }
  0x30   : > { %1273 = dma.hbm_to_vmem [thread:$0]  (!%p1699_p10), %s265_s12, 2048, %s267_s27, [#allocation9], %s2184_s29, %s2184_s29, %s2183_s22  }
  0x31   : > { %s1247_s20 = sshll.u32 %s1586_s28, 8  ;;  %s297_s21 = sshll.u32 %s287_s1, 4  ;;  %s298_s21 = int_to_ptr.vmem [resolvable:$true] %s297_s21 }
  0x32   : > { %s294_s16 = scalar_lea.hbm %s2143_s0, %s1247_s20  ;;  %s284_s19 = scalar_lea.sflag [#allocation3], %s1726_s8 }
  0x33   : > { %s295_s23 = sshll.u32 %s294_s16, 4  ;;  %353 = sbr.rel (%p1691_p8) target bundleno = 869 (0x365), region = 48  ;;  %s296_s23 = int_to_ptr.hbm [resolvable:$true] %s295_s23 }
  0x34   : > { %1277 = dma.hbm_to_vmem [thread:$0]  (!%p1728_p11), %s296_s23, 4096, %s298_s21, %s284_s19, %s2184_s29, %s2184_s29, %s2183_s22  }
  0x35   : > { %1283 = dma.hbm_to_vmem [thread:$0]  (!%p1728_p11), %s340_s18, 2048, %s342_s3, %s308_s24, %s2184_s29, %s2184_s29, %s2183_s22  }
  0x36   : > { %s1776_s7 = sand.u32 (!%p1691_p8), 1, %s1574_s25  }
  0x37   : > { %s1236_s27 = sshll.u32 (!%p1691_p8), %s1776_s7, 8  ;;  %s356_s17 = scalar_lea.sflag (!%p1691_p8), [#allocation3], %s1776_s7 }
  0x38   : > { %s1782_s8 = scalar_lea.vmem [#allocation2], %s1236_s27 }
  0x39   : > { %1553 = dma.done.wait (%p1678_p4), %s356_s17, 4096  }
  0x3a   : > { %1555 = vsyncadd (%p1678_p4), %s356_s17, 4294963200  ;;  %s365_s24 = sand.u32 1, %s1669_s30   ;;  %s1237_s29 = sshll.u32 %s1776_s7, 7 }
  0x3b   : > { %s366_s14 = scalar_lea.sflag [#allocation6], %s365_s24  ;;  %s1790_s22 = scalar_lea.vmem [#allocation5], %s1237_s29 }
  0x3c   : > { %1557 = dma.done.wait (%p1678_p4), %s366_s14, 4096  }
  0x3d   : > { %1559 = vsyncadd (%p1678_p4), %s366_s14, 4294963200  ;;  %s1796_s11 = scalar_lea.vmem [#allocation7], %s1237_s29 }
  0x3e   : > { %1561 = dma.done.wait (%p62_p1), [#allocation9], 4096  }
  0x3f   : > { %1563 = vsyncadd (%p62_p1), [#allocation9], 4294963200  ;;  %v480_v0 = vld [vmem:[#allocation8 + $0x78] sm:$0xff]  ;;  %v479_v1 = vld [vmem:[#allocation8 + $0x70] sm:$0xff]  ;;  %s2008_s10 = scalar_lea.vmem [#allocation11], %s1236_s27  ;;  %s2185_s12 = sld [smem:[#allocation18_spill]] }
  0x40   : > { %485 = vmatpush.msra.mxu0 %v480_v0  ;;  %v478_v2 = vld [vmem:[#allocation8 + $0x68] sm:$0xff]  ;;  %v477_v3 = vld [vmem:[#allocation8 + $0x60] sm:$0xff]  ;;  %v476_v4 = vld [vmem:[#allocation8 + $0x58] sm:$0xff]  ;;  %s2186_s15 = sld [smem:[#allocation26_spill]]  ;;  %s1068_s1 = sshll.u32 %s2008_s10, 4  ;;  %s1069_s1 = int_to_ptr.vmem [resolvable:$true] %s1068_s1 }
  0x41   : > { %v475_v5 = vld [vmem:[#allocation8 + $0x50] sm:$0xff]  ;;  %v474_v6 = vld [vmem:[#allocation8 + $0x48] sm:$0xff]  ;;  %v473_v7 = vld [vmem:[#allocation8 + $0x40] sm:$0xff]  ;;  %s1054_s19 = scalar_lea.sflag [#allocation4], %s1776_s7 }
  0x42   : > { %486 = vmatpush.msra.mxu0 %v479_v1  ;;  %v472_v8 = vld [vmem:[#allocation8 + $0x38] sm:$0xff]  ;;  %v471_v9 = vld [vmem:[#allocation8 + $0x30] sm:$0xff]  ;;  %v470_v10 = vld [vmem:[#allocation8 + $0x28] sm:$0xff] }
  0x43   : > { %v469_v11 = vld [vmem:[#allocation8 + $0x20] sm:$0xff]  ;;  %v468_v12 = vld [vmem:[#allocation8 + $0x18] sm:$0xff]  ;;  %v467_v13 = vld [vmem:[#allocation8 + $0x10] sm:$0xff] }
  0x44   : > { %487 = vmatpush.msra.mxu0 %v478_v2  ;;  %v466_v14 = vld [vmem:[#allocation8 + $0x8] sm:$0xff]  ;;  %v465_v15 = vld [vmem:[#allocation8] sm:$0xff]  ;;  %v1811_v18 = vld [vmem:[%s1782_s8 + $0x10] sm:$0xff] }
  0x45   : > { %v1803_v16 = vld [vmem:[%s1782_s8] sm:$0xff]  ;;  %v1807_v17 = vld [vmem:[%s1782_s8 + $0x8] sm:$0xff]  ;;  %v1815_v19 = vld [vmem:[%s1782_s8 + $0x18] sm:$0xff]  ;;  %s1250_s26 = sshll.u32 %s2185_s12, 8 }
  0x46   : > { %488 = vmatpush.msra.mxu0 %v477_v3  ;;  %v1819_v20 = vld [vmem:[%s1782_s8 + $0x20] sm:$0xff]  ;;  %v1823_v21 = vld [vmem:[%s1782_s8 + $0x28] sm:$0xff]  ;;  %v1827_v22 = vld [vmem:[%s1782_s8 + $0x30] sm:$0xff]  ;;  %s1067_s23 = scalar_lea.hbm %s2186_s15, %s1250_s26  ;;  %s1520_s29 = scalar_lea.hbm %s2186_s15, 512 }
  0x47   : > { %v1831_v23 = vld [vmem:[%s1782_s8 + $0x38] sm:$0xff]  ;;  %v1835_v24 = vld [vmem:[%s1782_s8 + $0x40] sm:$0xff]  ;;  %v612_v26 = vld [vmem:[%s1790_s22 + $0x70] sm:$0xff]  ;;  %s1070_s21 = sshll.u32 %s1067_s23, 4  ;;  %s1071_s21 = int_to_ptr.hbm [resolvable:$true] %s1070_s21 }
  0x48   : > { %489 = vmatpush.msra.mxu0 %v476_v4  ;;  %v613_v25 = vld [vmem:[%s1790_s22 + $0x78] sm:$0xff]  ;;  %v611_v27 = vld [vmem:[%s1790_s22 + $0x68] sm:$0xff]  ;;  %v610_v28 = vld [vmem:[%s1790_s22 + $0x60] sm:$0xff]  ;;  %s1514_s27 = sshra.s32 %s1071_s21, 4  ;;  %s1515_s27 = int_to_ptr.hbm [resolvable:$true] %s1514_s27 }
  0x49   : > { %614 = vmatpush.msra.mxu1 %v613_v25  ;;  %v1843_v29 = vld [vmem:[%s1782_s8 + $0x48] sm:$0xff]  ;;  %v609_v30 = vld [vmem:[%s1790_s22 + $0x58] sm:$0xff]  ;;  %v608_v31 = vld [vmem:[%s1790_s22 + $0x50] sm:$0xff]  ;;  %s1516_s17 = scalar_lea.hbm %s1515_s27, 256  ;;  %p1521_p8 = scmp.lt.s32.totalorder %s1515_s27, %s2186_s15 }
  0x4a   : > { %490 = vmatpush.msra.mxu0 %v475_v5  ;;  %v607_v32 = vld [vmem:[%s1790_s22 + $0x48] sm:$0xff]  ;;  %v606_v33 = vld [vmem:[%s1790_s22 + $0x40] sm:$0xff]  ;;  %v1851_v34 = vld [vmem:[%s1782_s8 + $0x50] sm:$0xff]  ;;  %p1517_p1 = scmp.ne.s32.totalorder %s1515_s27, %s1516_s17  ;;  %p1522_p10 = scmp.lt.s32.totalorder %s1520_s29, %s1516_s17 }
  0x4b   : > { %615 = vmatpush.msra.mxu1 %v612_v26  ;;  %v605_v35 = vld [vmem:[%s1790_s22 + $0x38] sm:$0xff]  ;;  %v604_v36 = vld [vmem:[%s1790_s22 + $0x30] sm:$0xff]  ;;  %v603_v37 = vld [vmem:[%s1790_s22 + $0x28] sm:$0xff] }
  0x4c   : > { %491 = vmatpush.msra.mxu0 %v474_v6  ;;  %v602_v38 = vld [vmem:[%s1790_s22 + $0x20] sm:$0xff]  ;;  %v1859_v39 = vld [vmem:[%s1782_s8 + $0x58] sm:$0xff]  ;;  %v600_v41 = vld [vmem:[%s1790_s22 + $0x10] sm:$0xff]  ;;  %p1518_p2 = pnand %p1517_p1, %p1718_p5  ;;  %p1523_p11 = por %p1522_p10, %p1521_p8 }
  0x4d   : > { %616 = vmatpush.msra.mxu1 %v611_v27  ;;  %v601_v40 = vld [vmem:[%s1790_s22 + $0x18] sm:$0xff]  ;;  %v599_v42 = vld [vmem:[%s1790_s22 + $0x8] sm:$0xff]  ;;  %v1866_v43 = vld [vmem:[%s1782_s8 + $0x60] sm:$0xff] }
  0x4e   : > { %492 = vmatpush.msra.mxu0 %v473_v7  ;;  %v598_v44 = vld [vmem:[%s1790_s22] sm:$0xff]  ;;  %v1871_v45 = vld [vmem:[%s1782_s8 + $0x68] sm:$0xff]  ;;  %v1875_v46 = vld [vmem:[%s1782_s8 + $0x70] sm:$0xff]  ;;  %p1519_p4 = pneg %p1518_p2 }
  0x4f   : > { %617 = vmatpush.msra.mxu1 %v610_v28  ;;  %v1879_v47 = vld [vmem:[%s1782_s8 + $0x78] sm:$0xff]  ;;  %v1885_v48 = vld [vmem:[%s2147_s4] ss:$0 sm:$0xff]  ;;  %v1893_v53 = vld [vmem:[%s1782_s8 + $0x88] sm:$0xff] }
  0x50   : > { %493 = vmatpush.msra.mxu0 %v472_v8  ;;  %v1888_v50 = vld [vmem:[%s1782_s8 + $0x80] sm:$0xff]  ;;  %v1898_v56 = vld [vmem:[%s1782_s8 + $0x90] sm:$0xff]  ;;  %v1903_v59 = vld [vmem:[%s1782_s8 + $0x98] sm:$0xff]  ;;  %p1524_p12 = pnand %p1523_p11, %p1519_p4 }
  0x51   : > { %618 = vmatpush.msra.mxu1 %v609_v30  ;;  %v1908_v62 = vld [vmem:[%s1782_s8 + $0xa0] sm:$0xff]  ;;  %v1913_v1 = vld [vmem:[%s1782_s8 + $0xa8] sm:$0xff]  ;;  %v1918_v4 = vld [vmem:[%s1782_s8 + $0xb0] sm:$0xff] }
  0x52   : > { %494 = vmatpush.msra.mxu0 %v471_v9  ;;  %v1923_v7 = vld [vmem:[%s1782_s8 + $0xb8] sm:$0xff]  ;;  %v1937_v26 = vld [vmem:[%s1782_s8 + $0xc8] sm:$0xff]  ;;  %v737_v30 = vld [vmem:[%s1796_s11 + $0x50] sm:$0xff] }
  0x53   : > { %619 = vmatpush.msra.mxu1 %v608_v31  ;;  %v738_v28 = vld [vmem:[%s1796_s11 + $0x58] sm:$0xff]  ;;  %v736_v31 = vld [vmem:[%s1796_s11 + $0x48] sm:$0xff] }
  0x54   : > { %495 = vmatpush.msra.mxu0 %v470_v10  ;;  %v1928_v10 = vld [vmem:[%s1782_s8 + $0xc0] sm:$0xff] }
  0x55   : > { %620 = vmatpush.msra.mxu1 %v607_v32  ;;  %v735_v32 = vld [vmem:[%s1796_s11 + $0x40] sm:$0xff] }
  0x56   : > { %496 = vmatpush.msra.mxu0 %v469_v11 }
  0x57   : > { %621 = vmatpush.msra.mxu1 %v606_v33 }
  0x58   : > { %497 = vmatpush.msra.mxu0 %v468_v12  ;;  %v742_v12 = vld [vmem:[%s1796_s11 + $0x78] sm:$0xff] }
  0x59   : > { %622 = vmatpush.msra.mxu1 %v605_v35  ;;  %743 = vmatpush.msra.mxu2 %v742_v12  ;;  %v1946_v35 = vld [vmem:[%s1782_s8 + $0xd0] sm:$0xff] }
  0x5a   : > { %498 = vmatpush.msra.mxu0 %v467_v13  ;;  %v741_v13 = vld [vmem:[%s1796_s11 + $0x70] sm:$0xff] }
  0x5b   : > { %623 = vmatpush.msra.mxu1 %v604_v36  ;;  %744 = vmatpush.msra.mxu2 %v741_v13 }
  0x5c   : > { %499 = vmatpush.msra.mxu0 %v466_v14  ;;  %v740_v14 = vld [vmem:[%s1796_s11 + $0x68] sm:$0xff] }
  0x5d   : > { %624 = vmatpush.msra.mxu1 %v603_v37  ;;  %745 = vmatpush.msra.mxu2 %v740_v14  ;;  %v734_v37 = vld [vmem:[%s1796_s11 + $0x38] sm:$0xff] }
  0x5e   : > { %500 = vmatpush.msra.mxu0 %v465_v15  ;;  %v739_v15 = vld [vmem:[%s1796_s11 + $0x60] sm:$0xff] }
  0x5f   : > { %501 = vmatmul.f32.vlgmr.msra.gmra.mxu0 %v1803_v16  ;;  %625 = vmatpush.msra.mxu1 %v602_v38  ;;  %v733_v38 = vld [vmem:[%s1796_s11 + $0x30] sm:$0xff] }
  0x60   : > { %746 = vmatpush.msra.mxu2 %v739_v15 }
  0x61   : > { %626 = vmatpush.msra.mxu1 %v601_v40  ;;  %v732_v40 = vld [vmem:[%s1796_s11 + $0x28] sm:$0xff] }
  0x62   : > { %747 = vmatpush.msra.mxu2 %v738_v28 }
  0x63   : > { %627 = vmatpush.msra.mxu1 %v600_v41  ;;  %v731_v41 = vld [vmem:[%s1796_s11 + $0x20] sm:$0xff] }
  0x64   : > { %748 = vmatpush.msra.mxu2 %v737_v30 }
  0x65   : > { %628 = vmatpush.msra.mxu1 %v599_v42 }
  0x66   : > { %749 = vmatpush.msra.mxu2 %v736_v31 }
  0x67   : > { %504 = vmatmul.f32.gmra.mxu0 %v1807_v17  ;;  %629 = vmatpush.msra.mxu1 %v598_v44  ;;  %v1955_v44 = vld [vmem:[%s1782_s8 + $0xd8] sm:$0xff] }
  0x68   : > { %750 = vmatpush.msra.mxu2 %v735_v32 }
  0x6a   : > { %751 = vmatpush.msra.mxu2 %v734_v37 }
  0x6c   : > { %752 = vmatpush.msra.mxu2 %v733_v38 }
  0x6e   : > { %753 = vmatpush.msra.mxu2 %v732_v40 }
  0x6f   : > { %507 = vmatmul.f32.gmra.mxu0 %v1811_v18 }
  0x70   : > { %754 = vmatpush.msra.mxu2 %v731_v41 }
  0x77   : > { %510 = vmatmul.f32.gmra.mxu0 %v1815_v19 }
  0x7f   : > { %513 = vmatmul.f32.gmra.mxu0 %v1819_v20 }
  0x87   : > { %516 = vmatmul.f32.gmra.mxu0 %v1823_v21 }
  0x8f   : > { %519 = vmatmul.f32.gmra.mxu0 %v1827_v22 }
  0x97   : > { %522 = vmatmul.f32.gmra.mxu0 %v1831_v23 }
  0x9f   : > { %525 = vmatmul.f32.gmra.mxu0 %v1835_v24 }
  0xa7   : > { %528 = vmatmul.f32.gmra.mxu0 %v1843_v29 }
  0xaf   : > { %531 = vmatmul.f32.gmra.mxu0 %v1851_v34 }
  0xb7   : > { %534 = vmatmul.f32.gmra.mxu0 %v1859_v39 }
  0xbf   : > { %537 = vmatmul.f32.gmra.mxu0 %v1866_v43 }
  0xc7   : > { %540 = vmatmul.f32.gmra.mxu0 %v1871_v45 }
  0xcf   : > { %543 = vmatmul.f32.gmra.mxu0 %v1875_v46 }
  0xd7   : > { %546 = vmatmul.f32.gmra.mxu0 %v1879_v47 }
  0xdc   : > { %v502_v49 = vpop.f32.mrf.mxu0 }
  0xdd   : > { %v503_v51 = vadd.f32 %v1885_v48, %v502_v49 }
  0xdf   : > { %549 = vmatmul.f32.gmra.mxu0 %v1888_v50  ;;  %630 = vmatmul.f32.vlgmr.msra.gmra.mxu1 %v503_v51  ;;  %v730_v51 = vld [vmem:[%s1796_s11 + $0x18] sm:$0xff] }
  0xe0   : > { %755 = vmatpush.msra.mxu2 %v730_v51 }
  0xe4   : > { %v505_v52 = vpop.f32.mrf.mxu0 }
  0xe5   : > { %v506_v54 = vadd.f32 %v1885_v48, %v505_v52  ;;  %v729_v52 = vld [vmem:[%s1796_s11 + $0x10] sm:$0xff] }
  0xe6   : > { %756 = vmatpush.msra.mxu2 %v729_v52 }
  0xe7   : > { %552 = vmatmul.f32.gmra.mxu0 %v1893_v53  ;;  %633 = vmatmul.f32.gmra.mxu1 %v506_v54  ;;  %v728_v54 = vld [vmem:[%s1796_s11 + $0x8] sm:$0xff] }
  0xe8   : > { %757 = vmatpush.msra.mxu2 %v728_v54 }
  0xec   : > { %v508_v55 = vpop.f32.mrf.mxu0 }
  0xed   : > { %v509_v57 = vadd.f32 %v1885_v48, %v508_v55  ;;  %v727_v55 = vld [vmem:[%s1796_s11] sm:$0xff] }
  0xee   : > { %758 = vmatpush.msra.mxu2 %v727_v55 }
  0xef   : > { %555 = vmatmul.f32.gmra.mxu0 %v1898_v56  ;;  %636 = vmatmul.f32.gmra.mxu1 %v509_v57 }
  0xf4   : > { %v511_v58 = vpop.f32.mrf.mxu0 }
  0xf5   : > { %v512_v60 = vadd.f32 %v1885_v48, %v511_v58  ;;  %v1964_v58 = vld [vmem:[%s1782_s8 + $0xe0] sm:$0xff] }
  0xf7   : > { %558 = vmatmul.f32.gmra.mxu0 %v1903_v59  ;;  %639 = vmatmul.f32.gmra.mxu1 %v512_v60 }
  0xfc   : > { %v514_v61 = vpop.f32.mrf.mxu0 }
  0xfd   : > { %v515_v63 = vadd.f32 %v1885_v48, %v514_v61 }
  0xff   : > { %561 = vmatmul.f32.gmra.mxu0 %v1908_v62  ;;  %642 = vmatmul.f32.gmra.mxu1 %v515_v63  ;;  %v1969_v63 = vld [vmem:[%s1782_s8 + $0xe8] sm:$0xff] }
 0x104   : > { %v517_v0 = vpop.f32.mrf.mxu0 }
 0x105   : > { %v518_v2 = vadd.f32 %v1885_v48, %v517_v0 }
 0x107   : > { %564 = vmatmul.f32.gmra.mxu0 %v1913_v1  ;;  %645 = vmatmul.f32.gmra.mxu1 %v518_v2 }
 0x10c   : > { %v520_v3 = vpop.f32.mrf.mxu0 }
 0x10d   : > { %v521_v5 = vadd.f32 %v1885_v48, %v520_v3  ;;  %v1974_v3 = vld [vmem:[%s1782_s8 + $0xf0] sm:$0xff] }
 0x10f   : > { %567 = vmatmul.f32.gmra.mxu0 %v1918_v4  ;;  %648 = vmatmul.f32.gmra.mxu1 %v521_v5 }
 0x114   : > { %v523_v6 = vpop.f32.mrf.mxu0 }
 0x115   : > { %v524_v8 = vadd.f32 %v1885_v48, %v523_v6 }
 0x117   : > { %570 = vmatmul.f32.gmra.mxu0 %v1923_v7  ;;  %651 = vmatmul.f32.gmra.mxu1 %v524_v8  ;;  %v1979_v8 = vld [vmem:[%s1782_s8 + $0xf8] sm:$0xff] }
 0x11c   : > { %v526_v9 = vpop.f32.mrf.mxu0 }
 0x11d   : > { %v527_v11 = vadd.f32 %v1885_v48, %v526_v9 }
 0x11f   : > { %573 = vmatmul.f32.gmra.mxu0 %v1928_v10  ;;  %654 = vmatmul.f32.gmra.mxu1 %v527_v11 }
 0x124   : > { %v529_v25 = vpop.f32.mrf.mxu0 }
 0x125   : > { %v530_v27 = vadd.f32 %v1885_v48, %v529_v25 }
 0x127   : > { %576 = vmatmul.f32.gmra.mxu0 %v1937_v26  ;;  %657 = vmatmul.f32.gmra.mxu1 %v530_v27 }
 0x12c   : > { %v532_v33 = vpop.f32.mrf.mxu0 }
 0x12d   : > { %v533_v36 = vadd.f32 %v1885_v48, %v532_v33 }
 0x12f   : > { %579 = vmatmul.f32.gmra.mxu0 %v1946_v35  ;;  %660 = vmatmul.f32.gmra.mxu1 %v533_v36 }
 0x134   : > { %v535_v42 = vpop.f32.mrf.mxu0 }
 0x135   : > { %v536_v49 = vadd.f32 %v1885_v48, %v535_v42 }
 0x137   : > { %582 = vmatmul.f32.gmra.mxu0 %v1955_v44  ;;  %663 = vmatmul.f32.gmra.mxu1 %v536_v49 }
 0x13c   : > { %v538_v57 = vpop.f32.mrf.mxu0 }
 0x13d   : > { %v539_v60 = vadd.f32 %v1885_v48, %v538_v57 }
 0x13f   : > { %585 = vmatmul.f32.gmra.mxu0 %v1964_v58  ;;  %666 = vmatmul.f32.gmra.mxu1 %v539_v60 }
 0x144   : > { %v541_v61 = vpop.f32.mrf.mxu0 }
 0x145   : > { %v542_v0 = vadd.f32 %v1885_v48, %v541_v61 }
 0x147   : > { %588 = vmatmul.f32.gmra.mxu0 %v1969_v63  ;;  %669 = vmatmul.f32.gmra.mxu1 %v542_v0 }
 0x14c   : > { %v544_v2 = vpop.f32.mrf.mxu0 }
 0x14d   : > { %v545_v5 = vadd.f32 %v1885_v48, %v544_v2  ;;  %v871_v2 = vld [vmem:[#allocation10 + $0x78] sm:$0xff] }
 0x14e   : > { %876 = vmatpush.msra.mxu3 %v871_v2 }
 0x14f   : > { %591 = vmatmul.f32.gmra.mxu0 %v1974_v3  ;;  %672 = vmatmul.f32.gmra.mxu1 %v545_v5  ;;  %v870_v5 = vld [vmem:[#allocation10 + $0x70] sm:$0xff] }
 0x150   : > { %877 = vmatpush.msra.mxu3 %v870_v5 }
 0x154   : > { %v547_v6 = vpop.f32.mrf.mxu0 }
 0x155   : > { %v548_v9 = vadd.f32 %v1885_v48, %v547_v6 }
 0x157   : > { %594 = vmatmul.f32.gmra.mxu0 %v1979_v8  ;;  %675 = vmatmul.f32.gmra.mxu1 %v548_v9 }
 0x15c   : > { %v550_v11 = vpop.f32.mrf.mxu0  ;;  %v631_v12 = vpop.f32.mrf.mxu1 }
 0x15d   : > { %v551_v13 = vadd.f32 %v1885_v48, %v550_v11  ;;  %759 = vmatmul.f32.vlgmr.msra.gmra.mxu2 %v631_v12  ;;  %v869_v12 = vld [vmem:[#allocation10 + $0x68] sm:$0xff] }
 0x15e   : > { %878 = vmatpush.msra.mxu3 %v869_v12 }
 0x15f   : > { %678 = vmatmul.f32.gmra.mxu1 %v551_v13  ;;  %v868_v13 = vld [vmem:[#allocation10 + $0x60] sm:$0xff] }
 0x160   : > { %879 = vmatpush.msra.mxu3 %v868_v13 }
 0x164   : > { %v553_v14 = vpop.f32.mrf.mxu0  ;;  %v634_v15 = vpop.f32.mrf.mxu1 }
 0x165   : > { %v554_v25 = vadd.f32 %v1885_v48, %v553_v14  ;;  %762 = vmatmul.f32.gmra.mxu2 %v634_v15  ;;  %v867_v14 = vld [vmem:[#allocation10 + $0x58] sm:$0xff]  ;;  %v866_v15 = vld [vmem:[#allocation10 + $0x50] sm:$0xff] }
 0x166   : > { %880 = vmatpush.msra.mxu3 %v867_v14 }
 0x167   : > { %681 = vmatmul.f32.gmra.mxu1 %v554_v25 }
 0x168   : > { %881 = vmatpush.msra.mxu3 %v866_v15 }
 0x16c   : > { %v556_v27 = vpop.f32.mrf.mxu0  ;;  %v637_v28 = vpop.f32.mrf.mxu1 }
 0x16d   : > { %v557_v30 = vadd.f32 %v1885_v48, %v556_v27  ;;  %765 = vmatmul.f32.gmra.mxu2 %v637_v28 }
 0x16f   : > { %684 = vmatmul.f32.gmra.mxu1 %v557_v30  ;;  %v865_v30 = vld [vmem:[#allocation10 + $0x48] sm:$0xff] }
 0x170   : > { %882 = vmatpush.msra.mxu3 %v865_v30 }
 0x174   : > { %v559_v31 = vpop.f32.mrf.mxu0  ;;  %v640_v32 = vpop.f32.mrf.mxu1 }
 0x175   : > { %v560_v33 = vadd.f32 %v1885_v48, %v559_v31  ;;  %768 = vmatmul.f32.gmra.mxu2 %v640_v32  ;;  %v864_v31 = vld [vmem:[#allocation10 + $0x40] sm:$0xff]  ;;  %v863_v32 = vld [vmem:[#allocation10 + $0x38] sm:$0xff] }
 0x176   : > { %883 = vmatpush.msra.mxu3 %v864_v31 }
 0x177   : > { %687 = vmatmul.f32.gmra.mxu1 %v560_v33  ;;  %v862_v33 = vld [vmem:[#allocation10 + $0x30] sm:$0xff] }
 0x178   : > { %884 = vmatpush.msra.mxu3 %v863_v32 }
 0x17a   : > { %885 = vmatpush.msra.mxu3 %v862_v33 }
 0x17c   : > { %v562_v36 = vpop.f32.mrf.mxu0  ;;  %v643_v37 = vpop.f32.mrf.mxu1 }
 0x17d   : > { %v563_v38 = vadd.f32 %v1885_v48, %v562_v36  ;;  %771 = vmatmul.f32.gmra.mxu2 %v643_v37 }
 0x17f   : > { %690 = vmatmul.f32.gmra.mxu1 %v563_v38 }
 0x184   : > { %v565_v40 = vpop.f32.mrf.mxu0  ;;  %v646_v41 = vpop.f32.mrf.mxu1 }
 0x185   : > { %v566_v42 = vadd.f32 %v1885_v48, %v565_v40  ;;  %774 = vmatmul.f32.gmra.mxu2 %v646_v41  ;;  %v861_v40 = vld [vmem:[#allocation10 + $0x28] sm:$0xff]  ;;  %v860_v41 = vld [vmem:[#allocation10 + $0x20] sm:$0xff] }
 0x186   : > { %886 = vmatpush.msra.mxu3 %v861_v40 }
 0x187   : > { %693 = vmatmul.f32.gmra.mxu1 %v566_v42  ;;  %v859_v42 = vld [vmem:[#allocation10 + $0x18] sm:$0xff] }
 0x188   : > { %887 = vmatpush.msra.mxu3 %v860_v41 }
 0x18a   : > { %888 = vmatpush.msra.mxu3 %v859_v42 }
 0x18c   : > { %v568_v49 = vpop.f32.mrf.mxu0  ;;  %v649_v51 = vpop.f32.mrf.mxu1 }
 0x18d   : > { %v569_v52 = vadd.f32 %v1885_v48, %v568_v49  ;;  %777 = vmatmul.f32.gmra.mxu2 %v649_v51  ;;  %v858_v49 = vld [vmem:[#allocation10 + $0x10] sm:$0xff] }
 0x18e   : > { %889 = vmatpush.msra.mxu3 %v858_v49 }
 0x18f   : > { %696 = vmatmul.f32.gmra.mxu1 %v569_v52 }
 0x194   : > { %v571_v54 = vpop.f32.mrf.mxu0  ;;  %v652_v55 = vpop.f32.mrf.mxu1 }
 0x195   : > { %v572_v57 = vadd.f32 %v1885_v48, %v571_v54  ;;  %780 = vmatmul.f32.gmra.mxu2 %v652_v55  ;;  %v857_v55 = vld [vmem:[#allocation10 + $0x8] sm:$0xff] }
 0x196   : > { %890 = vmatpush.msra.mxu3 %v857_v55 }
 0x197   : > { %699 = vmatmul.f32.gmra.mxu1 %v572_v57  ;;  %v856_v57 = vld [vmem:[#allocation10] sm:$0xff] }
 0x198   : > { %891 = vmatpush.msra.mxu3 %v856_v57 }
 0x19c   : > { %v574_v60 = vpop.f32.mrf.mxu0  ;;  %v655_v61 = vpop.f32.mrf.mxu1 }
 0x19d   : > { %v575_v0 = vadd.f32 %v1885_v48, %v574_v60  ;;  %783 = vmatmul.f32.gmra.mxu2 %v655_v61 }
 0x19f   : > { %702 = vmatmul.f32.gmra.mxu1 %v575_v0 }
 0x1a4   : > { %v577_v6 = vpop.f32.mrf.mxu0  ;;  %v658_v9 = vpop.f32.mrf.mxu1 }
 0x1a5   : > { %v578_v11 = vadd.f32 %v1885_v48, %v577_v6  ;;  %786 = vmatmul.f32.gmra.mxu2 %v658_v9 }
 0x1a7   : > { %705 = vmatmul.f32.gmra.mxu1 %v578_v11 }
 0x1ac   : > { %v580_v25 = vpop.f32.mrf.mxu0  ;;  %v661_v27 = vpop.f32.mrf.mxu1 }
 0x1ad   : > { %v581_v28 = vadd.f32 %v1885_v48, %v580_v25  ;;  %789 = vmatmul.f32.gmra.mxu2 %v661_v27 }
 0x1af   : > { %708 = vmatmul.f32.gmra.mxu1 %v581_v28 }
 0x1b4   : > { %v583_v36 = vpop.f32.mrf.mxu0  ;;  %v664_v37 = vpop.f32.mrf.mxu1 }
 0x1b5   : > { %v584_v38 = vadd.f32 %v1885_v48, %v583_v36  ;;  %792 = vmatmul.f32.gmra.mxu2 %v664_v37 }
 0x1b7   : > { %711 = vmatmul.f32.gmra.mxu1 %v584_v38 }
 0x1bc   : > { %v586_v51 = vpop.f32.mrf.mxu0  ;;  %v667_v52 = vpop.f32.mrf.mxu1 }
 0x1bd   : > { %v587_v54 = vadd.f32 %v1885_v48, %v586_v51  ;;  %795 = vmatmul.f32.gmra.mxu2 %v667_v52 }
 0x1bf   : > { %714 = vmatmul.f32.gmra.mxu1 %v587_v54 }
 0x1c4   : > { %v589_v60 = vpop.f32.mrf.mxu0  ;;  %v670_v61 = vpop.f32.mrf.mxu1 }
 0x1c5   : > { %v590_v0 = vadd.f32 %v1885_v48, %v589_v60  ;;  %798 = vmatmul.f32.gmra.mxu2 %v670_v61 }
 0x1c7   : > { %717 = vmatmul.f32.gmra.mxu1 %v590_v0 }
 0x1cc   : > { %v592_v2 = vpop.f32.mrf.mxu0  ;;  %v673_v5 = vpop.f32.mrf.mxu1 }
 0x1cd   : > { %v593_v6 = vadd.f32 %v1885_v48, %v592_v2  ;;  %801 = vmatmul.f32.gmra.mxu2 %v673_v5 }
 0x1cf   : > { %720 = vmatmul.f32.gmra.mxu1 %v593_v6 }
 0x1d4   : > { %v595_v9 = vpop.f32.mrf.mxu0  ;;  %v676_v11 = vpop.f32.mrf.mxu1 }
 0x1d5   : > { %v596_v12 = vadd.f32 %v1885_v48, %v595_v9  ;;  %804 = vmatmul.f32.gmra.mxu2 %v676_v11 }
 0x1d7   : > { %723 = vmatmul.f32.gmra.mxu1 %v596_v12 }
 0x1dc   : > { %v679_v13 = vpop.f32.mrf.mxu1 }
 0x1dd   : > { %807 = vmatmul.f32.gmra.mxu2 %v679_v13 }
 0x1e0   : > { %v760_v14 = vpop.f32.mrf.mxu2 }
 0x1e1   : > { %892 = vmatmul.f32.vlgmr.msra.gmra.mxu3 %v760_v14  ;;  %v2002_v14 = vld [vmem:[%s2149_s6] ss:$0 sm:$0xff] }
 0x1e4   : > { %v682_v15 = vpop.f32.mrf.mxu1 }
 0x1e5   : > { %810 = vmatmul.f32.gmra.mxu2 %v682_v15 }
 0x1e8   : > { %v763_v25 = vpop.f32.mrf.mxu2 }
 0x1e9   : > { %895 = vmatmul.f32.gmra.mxu3 %v763_v25 }
 0x1ec   : > { %v685_v27 = vpop.f32.mrf.mxu1 }
 0x1ed   : > { %813 = vmatmul.f32.gmra.mxu2 %v685_v27 }
 0x1f0   : > { %v766_v28 = vpop.f32.mrf.mxu2 }
 0x1f1   : > { %898 = vmatmul.f32.gmra.mxu3 %v766_v28 }
 0x1f4   : > { %v688_v30 = vpop.f32.mrf.mxu1 }
 0x1f5   : > { %816 = vmatmul.f32.gmra.mxu2 %v688_v30 }
 0x1f8   : > { %v769_v31 = vpop.f32.mrf.mxu2 }
 0x1f9   : > { %901 = vmatmul.f32.gmra.mxu3 %v769_v31 }
 0x1fc   : > { %v691_v32 = vpop.f32.mrf.mxu1 }
 0x1fd   : > { %819 = vmatmul.f32.gmra.mxu2 %v691_v32 }
 0x200   : > { %v772_v48 = vpop.f32.mrf.mxu2 }
 0x201   : > { %904 = vmatmul.f32.gmra.mxu3 %v772_v48 }
 0x204   : > { %v694_v33 = vpop.f32.mrf.mxu1 }
 0x205   : > { %822 = vmatmul.f32.gmra.mxu2 %v694_v33 }
 0x208   : > { %v775_v36 = vpop.f32.mrf.mxu2 }
 0x209   : > { %907 = vmatmul.f32.gmra.mxu3 %v775_v36 }
 0x20c   : > { %v697_v37 = vpop.f32.mrf.mxu1 }
 0x20d   : > { %825 = vmatmul.f32.gmra.mxu2 %v697_v37 }
 0x210   : > { %v778_v38 = vpop.f32.mrf.mxu2 }
 0x211   : > { %910 = vmatmul.f32.gmra.mxu3 %v778_v38 }
 0x214   : > { %v700_v40 = vpop.f32.mrf.mxu1 }
 0x215   : > { %828 = vmatmul.f32.gmra.mxu2 %v700_v40 }
 0x218   : > { %v781_v41 = vpop.f32.mrf.mxu2 }
 0x219   : > { %913 = vmatmul.f32.gmra.mxu3 %v781_v41 }
 0x21c   : > { %v703_v42 = vpop.f32.mrf.mxu1 }
 0x21d   : > { %831 = vmatmul.f32.gmra.mxu2 %v703_v42 }
 0x220   : > { %v784_v49 = vpop.f32.mrf.mxu2 }
 0x221   : > { %916 = vmatmul.f32.gmra.mxu3 %v784_v49 }
 0x224   : > { %v706_v51 = vpop.f32.mrf.mxu1 }
 0x225   : > { %834 = vmatmul.f32.gmra.mxu2 %v706_v51 }
 0x228   : > { %v787_v52 = vpop.f32.mrf.mxu2 }
 0x229   : > { %919 = vmatmul.f32.gmra.mxu3 %v787_v52 }
 0x22c   : > { %v709_v54 = vpop.f32.mrf.mxu1 }
 0x22d   : > { %837 = vmatmul.f32.gmra.mxu2 %v709_v54 }
 0x230   : > { %v790_v55 = vpop.f32.mrf.mxu2 }
 0x231   : > { %922 = vmatmul.f32.gmra.mxu3 %v790_v55 }
 0x234   : > { %v712_v57 = vpop.f32.mrf.mxu1 }
 0x235   : > { %840 = vmatmul.f32.gmra.mxu2 %v712_v57 }
 0x238   : > { %v793_v60 = vpop.f32.mrf.mxu2 }
 0x239   : > { %925 = vmatmul.f32.gmra.mxu3 %v793_v60 }
 0x23c   : > { %v715_v61 = vpop.f32.mrf.mxu1 }
 0x23d   : > { %843 = vmatmul.f32.gmra.mxu2 %v715_v61 }
 0x240   : > { %v796_v0 = vpop.f32.mrf.mxu2 }
 0x241   : > { %928 = vmatmul.f32.gmra.mxu3 %v796_v0 }
 0x244   : > { %v718_v2 = vpop.f32.mrf.mxu1 }
 0x245   : > { %846 = vmatmul.f32.gmra.mxu2 %v718_v2 }
 0x248   : > { %v799_v5 = vpop.f32.mrf.mxu2 }
 0x249   : > { %931 = vmatmul.f32.gmra.mxu3 %v799_v5 }
 0x24c   : > { %v721_v6 = vpop.f32.mrf.mxu1 }
 0x24d   : > { %849 = vmatmul.f32.gmra.mxu2 %v721_v6 }
 0x250   : > { %v802_v9 = vpop.f32.mrf.mxu2 }
 0x251   : > { %934 = vmatmul.f32.gmra.mxu3 %v802_v9 }
 0x254   : > { %v724_v11 = vpop.f32.mrf.mxu1 }
 0x255   : > { %852 = vmatmul.f32.gmra.mxu2 %v724_v11 }
 0x258   : > { %v805_v12 = vpop.f32.mrf.mxu2 }
 0x259   : > { %937 = vmatmul.f32.gmra.mxu3 %v805_v12 }
 0x260   : > { %v808_v13 = vpop.f32.mrf.mxu2 }
 0x261   : > { %940 = vmatmul.f32.gmra.mxu3 %v808_v13 }
 0x264   : > { %v893_v15 = vpop.f32.mrf.mxu3 }
 0x265   : > { %v894_v25 = vadd.f32 %v2002_v14, %v893_v15 }
 0x267   : > { %v989_v27 = vadd.f32 %v894_v25, %v1803_v16 }
 0x268   : > { %v811_v28 = vpop.f32.mrf.mxu2 }
 0x269   : > { %1021 = vst [vmem:[%s2008_s10] sm:$0xff] %v989_v27  ;;  %943 = vmatmul.f32.gmra.mxu3 %v811_v28 }
 0x26c   : > { %v896_v30 = vpop.f32.mrf.mxu3 }
 0x26d   : > { %v897_v31 = vadd.f32 %v2002_v14, %v896_v30 }
 0x26f   : > { %v990_v32 = vadd.f32 %v897_v31, %v1807_v17 }
 0x270   : > { %v814_v48 = vpop.f32.mrf.mxu2 }
 0x271   : > { %1022 = vst [vmem:[%s2008_s10 + $0x8] sm:$0xff] %v990_v32  ;;  %946 = vmatmul.f32.gmra.mxu3 %v814_v48 }
 0x274   : > { %v899_v33 = vpop.f32.mrf.mxu3 }
 0x275   : > { %v900_v16 = vadd.f32 %v2002_v14, %v899_v33 }
 0x277   : > { %v991_v36 = vadd.f32 %v900_v16, %v1811_v18 }
 0x278   : > { %v817_v37 = vpop.f32.mrf.mxu2 }
 0x279   : > { %1023 = vst [vmem:[%s2008_s10 + $0x10] sm:$0xff] %v991_v36  ;;  %949 = vmatmul.f32.gmra.mxu3 %v817_v37 }
 0x27c   : > { %v902_v38 = vpop.f32.mrf.mxu3 }
 0x27d   : > { %v903_v40 = vadd.f32 %v2002_v14, %v902_v38 }
 0x27f   : > { %v992_v41 = vadd.f32 %v903_v40, %v1815_v19 }
 0x280   : > { %v820_v42 = vpop.f32.mrf.mxu2 }
 0x281   : > { %1024 = vst [vmem:[%s2008_s10 + $0x18] sm:$0xff] %v992_v41  ;;  %952 = vmatmul.f32.gmra.mxu3 %v820_v42 }
 0x284   : > { %v905_v17 = vpop.f32.mrf.mxu3 }
 0x285   : > { %v906_v49 = vadd.f32 %v2002_v14, %v905_v17 }
 0x287   : > { %v993_v51 = vadd.f32 %v906_v49, %v1819_v20 }
 0x288   : > { %v823_v52 = vpop.f32.mrf.mxu2 }
 0x289   : > { %1025 = vst [vmem:[%s2008_s10 + $0x20] sm:$0xff] %v993_v51  ;;  %955 = vmatmul.f32.gmra.mxu3 %v823_v52 }
 0x28c   : > { %v908_v18 = vpop.f32.mrf.mxu3 }
 0x28d   : > { %v909_v54 = vadd.f32 %v2002_v14, %v908_v18 }
 0x28f   : > { %v994_v55 = vadd.f32 %v909_v54, %v1823_v21 }
 0x290   : > { %v826_v57 = vpop.f32.mrf.mxu2 }
 0x291   : > { %1026 = vst [vmem:[%s2008_s10 + $0x28] sm:$0xff] %v994_v55  ;;  %958 = vmatmul.f32.gmra.mxu3 %v826_v57 }
 0x294   : > { %v911_v19 = vpop.f32.mrf.mxu3 }
 0x295   : > { %v912_v60 = vadd.f32 %v2002_v14, %v911_v19 }
 0x297   : > { %v995_v61 = vadd.f32 %v912_v60, %v1827_v22 }
 0x298   : > { %v829_v0 = vpop.f32.mrf.mxu2 }
 0x299   : > { %1027 = vst [vmem:[%s2008_s10 + $0x30] sm:$0xff] %v995_v61  ;;  %961 = vmatmul.f32.gmra.mxu3 %v829_v0 }
 0x29c   : > { %v914_v20 = vpop.f32.mrf.mxu3 }
 0x29d   : > { %v915_v2 = vadd.f32 %v2002_v14, %v914_v20 }
 0x29f   : > { %v996_v5 = vadd.f32 %v915_v2, %v1831_v23 }
 0x2a0   : > { %v832_v6 = vpop.f32.mrf.mxu2 }
 0x2a1   : > { %1028 = vst [vmem:[%s2008_s10 + $0x38] sm:$0xff] %v996_v5  ;;  %964 = vmatmul.f32.gmra.mxu3 %v832_v6 }
 0x2a4   : > { %v917_v21 = vpop.f32.mrf.mxu3 }
 0x2a5   : > { %v918_v9 = vadd.f32 %v2002_v14, %v917_v21 }
 0x2a7   : > { %v997_v11 = vadd.f32 %v918_v9, %v1835_v24 }
 0x2a8   : > { %v835_v12 = vpop.f32.mrf.mxu2 }
 0x2a9   : > { %1029 = vst [vmem:[%s2008_s10 + $0x40] sm:$0xff] %v997_v11  ;;  %967 = vmatmul.f32.gmra.mxu3 %v835_v12 }
 0x2ac   : > { %v920_v22 = vpop.f32.mrf.mxu3 }
 0x2ad   : > { %v921_v13 = vadd.f32 %v2002_v14, %v920_v22 }
 0x2af   : > { %v998_v15 = vadd.f32 %v921_v13, %v1843_v29 }
 0x2b0   : > { %v838_v25 = vpop.f32.mrf.mxu2 }
 0x2b1   : > { %1030 = vst [vmem:[%s2008_s10 + $0x48] sm:$0xff] %v998_v15  ;;  %970 = vmatmul.f32.gmra.mxu3 %v838_v25 }
 0x2b4   : > { %v923_v23 = vpop.f32.mrf.mxu3 }
 0x2b5   : > { %v924_v27 = vadd.f32 %v2002_v14, %v923_v23 }
 0x2b7   : > { %v999_v28 = vadd.f32 %v924_v27, %v1851_v34 }
 0x2b8   : > { %v841_v30 = vpop.f32.mrf.mxu2 }
 0x2b9   : > { %1031 = vst [vmem:[%s2008_s10 + $0x50] sm:$0xff] %v999_v28  ;;  %973 = vmatmul.f32.gmra.mxu3 %v841_v30 }
 0x2bc   : > { %v926_v24 = vpop.f32.mrf.mxu3 }
 0x2bd   : > { %v927_v31 = vadd.f32 %v2002_v14, %v926_v24 }
 0x2bf   : > { %v1000_v32 = vadd.f32 %v927_v31, %v1859_v39 }
 0x2c0   : > { %v844_v48 = vpop.f32.mrf.mxu2 }
 0x2c1   : > { %1032 = vst [vmem:[%s2008_s10 + $0x58] sm:$0xff] %v1000_v32  ;;  %976 = vmatmul.f32.gmra.mxu3 %v844_v48 }
 0x2c4   : > { %v929_v29 = vpop.f32.mrf.mxu3 }
 0x2c5   : > { %v930_v33 = vadd.f32 %v2002_v14, %v929_v29 }
 0x2c7   : > { %v1001_v16 = vadd.f32 %v930_v33, %v1866_v43 }
 0x2c8   : > { %v847_v36 = vpop.f32.mrf.mxu2 }
 0x2c9   : > { %1033 = vst [vmem:[%s2008_s10 + $0x60] sm:$0xff] %v1001_v16  ;;  %979 = vmatmul.f32.gmra.mxu3 %v847_v36 }
 0x2cc   : > { %v932_v34 = vpop.f32.mrf.mxu3 }
 0x2cd   : > { %v933_v37 = vadd.f32 %v2002_v14, %v932_v34 }
 0x2cf   : > { %v1002_v38 = vadd.f32 %v933_v37, %v1871_v45 }
 0x2d0   : > { %v850_v40 = vpop.f32.mrf.mxu2 }
 0x2d1   : > { %1034 = vst [vmem:[%s2008_s10 + $0x68] sm:$0xff] %v1002_v38  ;;  %982 = vmatmul.f32.gmra.mxu3 %v850_v40 }
 0x2d4   : > { %v935_v39 = vpop.f32.mrf.mxu3 }
 0x2d5   : > { %v936_v41 = vadd.f32 %v2002_v14, %v935_v39 }
 0x2d7   : > { %v1003_v42 = vadd.f32 %v936_v41, %v1875_v46 }
 0x2d8   : > { %v853_v43 = vpop.f32.mrf.mxu2 }
 0x2d9   : > { %1035 = vst [vmem:[%s2008_s10 + $0x70] sm:$0xff] %v1003_v42  ;;  %985 = vmatmul.f32.gmra.mxu3 %v853_v43 }
 0x2dc   : > { %v938_v17 = vpop.f32.mrf.mxu3 }
 0x2dd   : > { %v939_v49 = vadd.f32 %v2002_v14, %v938_v17 }
 0x2df   : > { %v1004_v51 = vadd.f32 %v939_v49, %v1879_v47 }
 0x2e1   : > { %1036 = vst [vmem:[%s2008_s10 + $0x78] sm:$0xff] %v1004_v51 }
 0x2e4   : > { %v941_v45 = vpop.f32.mrf.mxu3 }
 0x2e5   : > { %v942_v52 = vadd.f32 %v2002_v14, %v941_v45 }
 0x2e7   : > { %v1005_v18 = vadd.f32 %v942_v52, %v1888_v50 }
 0x2e9   : > { %1037 = vst [vmem:[%s2008_s10 + $0x80] sm:$0xff] %v1005_v18 }
 0x2ec   : > { %v944_v54 = vpop.f32.mrf.mxu3 }
 0x2ed   : > { %v945_v46 = vadd.f32 %v2002_v14, %v944_v54 }
 0x2ef   : > { %v1006_v55 = vadd.f32 %v945_v46, %v1893_v53 }
 0x2f1   : > { %1038 = vst [vmem:[%s2008_s10 + $0x88] sm:$0xff] %v1006_v55 }
 0x2f4   : > { %v947_v57 = vpop.f32.mrf.mxu3 }
 0x2f5   : > { %v948_v19 = vadd.f32 %v2002_v14, %v947_v57 }
 0x2f7   : > { %v1007_v47 = vadd.f32 %v948_v19, %v1898_v56 }
 0x2f9   : > { %1039 = vst [vmem:[%s2008_s10 + $0x90] sm:$0xff] %v1007_v47 }
 0x2fc   : > { %v950_v60 = vpop.f32.mrf.mxu3 }
 0x2fd   : > { %v951_v61 = vadd.f32 %v2002_v14, %v950_v60 }
 0x2ff   : > { %v1008_v50 = vadd.f32 %v951_v61, %v1903_v59 }
 0x301   : > { %1040 = vst [vmem:[%s2008_s10 + $0x98] sm:$0xff] %v1008_v50 }
 0x304   : > { %v953_v0 = vpop.f32.mrf.mxu3 }
 0x305   : > { %v954_v20 = vadd.f32 %v2002_v14, %v953_v0 }
 0x307   : > { %v1009_v53 = vadd.f32 %v954_v20, %v1908_v62 }
 0x309   : > { %1041 = vst [vmem:[%s2008_s10 + $0xa0] sm:$0xff] %v1009_v53 }
 0x30c   : > { %v956_v2 = vpop.f32.mrf.mxu3 }
 0x30d   : > { %v957_v5 = vadd.f32 %v2002_v14, %v956_v2 }
 0x30f   : > { %v1010_v56 = vadd.f32 %v957_v5, %v1913_v1 }
 0x311   : > { %1042 = vst [vmem:[%s2008_s10 + $0xa8] sm:$0xff] %v1010_v56 }
 0x314   : > { %v959_v6 = vpop.f32.mrf.mxu3 }
 0x315   : > { %v960_v21 = vadd.f32 %v2002_v14, %v959_v6 }
 0x317   : > { %v1011_v59 = vadd.f32 %v960_v21, %v1918_v4 }
 0x319   : > { %1043 = vst [vmem:[%s2008_s10 + $0xb0] sm:$0xff] %v1011_v59 }
 0x31c   : > { %v962_v9 = vpop.f32.mrf.mxu3 }
 0x31d   : > { %v963_v11 = vadd.f32 %v2002_v14, %v962_v9 }
 0x31f   : > { %v1012_v62 = vadd.f32 %v963_v11, %v1923_v7 }
 0x321   : > { %1044 = vst [vmem:[%s2008_s10 + $0xb8] sm:$0xff] %v1012_v62 }
 0x324   : > { %v965_v12 = vpop.f32.mrf.mxu3 }
 0x325   : > { %v966_v22 = vadd.f32 %v2002_v14, %v965_v12 }
 0x327   : > { %v1013_v1 = vadd.f32 %v966_v22, %v1928_v10 }
 0x329   : > { %1045 = vst [vmem:[%s2008_s10 + $0xc0] sm:$0xff] %v1013_v1 }
 0x32c   : > { %v968_v13 = vpop.f32.mrf.mxu3 }
 0x32d   : > { %v969_v15 = vadd.f32 %v2002_v14, %v968_v13 }
 0x32f   : > { %v1014_v4 = vadd.f32 %v969_v15, %v1937_v26 }
 0x331   : > { %1046 = vst [vmem:[%s2008_s10 + $0xc8] sm:$0xff] %v1014_v4 }
 0x334   : > { %v971_v25 = vpop.f32.mrf.mxu3 }
 0x335   : > { %v972_v23 = vadd.f32 %v2002_v14, %v971_v25 }
 0x337   : > { %v1015_v7 = vadd.f32 %v972_v23, %v1946_v35 }
 0x339   : > { %1047 = vst [vmem:[%s2008_s10 + $0xd0] sm:$0xff] %v1015_v7 }
 0x33c   : > { %v974_v27 = vpop.f32.mrf.mxu3 }
 0x33d   : > { %v975_v28 = vadd.f32 %v2002_v14, %v974_v27 }
 0x33f   : > { %v1016_v10 = vadd.f32 %v975_v28, %v1955_v44 }
 0x341   : > { %1048 = vst [vmem:[%s2008_s10 + $0xd8] sm:$0xff] %v1016_v10 }
 0x344   : > { %v977_v30 = vpop.f32.mrf.mxu3 }
 0x345   : > { %v978_v26 = vadd.f32 %v2002_v14, %v977_v30 }
 0x347   : > { %v1017_v24 = vadd.f32 %v978_v26, %v1964_v58 }
 0x349   : > { %1049 = vst [vmem:[%s2008_s10 + $0xe0] sm:$0xff] %v1017_v24 }
 0x34c   : > { %v980_v31 = vpop.f32.mrf.mxu3 }
 0x34d   : > { %v981_v32 = vadd.f32 %v2002_v14, %v980_v31 }
 0x34f   : > { %v1018_v35 = vadd.f32 %v981_v32, %v1969_v63 }
 0x351   : > { %1050 = vst [vmem:[%s2008_s10 + $0xe8] sm:$0xff] %v1018_v35 }
 0x354   : > { %v983_v48 = vpop.f32.mrf.mxu3 }
 0x355   : > { %v984_v29 = vadd.f32 %v2002_v14, %v983_v48 }
 0x357   : > { %v1019_v44 = vadd.f32 %v984_v29, %v1974_v3 }
 0x359   : > { %1051 = vst [vmem:[%s2008_s10 + $0xf0] sm:$0xff] %v1019_v44 }
 0x35c   : > { %v986_v58 = vpop.f32.mrf.mxu3 }
 0x35d   : > { %v987_v33 = vadd.f32 %v2002_v14, %v986_v58 }
 0x35f   : > { %v1020_v63 = vadd.f32 %v987_v33, %v1979_v8 }
 0x361   : > { %1052 = vst [vmem:[%s2008_s10 + $0xf8] sm:$0xff] %v1020_v63 }
 0x362   : > { %1527 = shalt.err (!%p1524_p12)
}
 0x363   : > { %s1596_s7 = smov 128   ;;  %s1597_s11 = smov 8  }
 0x364   : > { %1265 = dma.vmem_to_hbm [thread:$0]  (%p1718_p5), %s1069_s1, 4096, %s1071_s21, %s1054_s19, %s1596_s7, %s1596_s7, %s1597_s11  }
 0x365 PF: > { %s2188_s30 = sld [smem:[#allocation16_spill]] }
 0x366   : > { %s2190_s18 = sld [smem:[#allocation19_spill]] }
 0x36b   : > { %s1085_s3 = sand.u32 1, %s2188_s30  }
 0x36c   : > { %p2191_p13 = scmp.ge.s32.totalorder %s2190_s18, 2  ;;  %s1086_s10 = scalar_lea.sflag [#allocation4], %s1085_s3 }
 0x36e   : > { %p1285_p0 = pnand %p2191_p13, %p1683_p6 }
 0x370   : > { %p1286_p3 = pneg %p1285_p0 }
 0x372   : > { %1565 = dma.done.wait (%p1286_p3), %s1086_s10, 4096  }
 0x373   : > { %1567 = vsyncadd (%p1286_p3), %s1086_s10, 4294963200  ;;  %s27_s29 = sadd.s32 1, %s2190_s18   ;;  %s2192_s12 = sld [smem:[#allocation17_spill]] }
 0x374   : > { %p24_p7 = scmp.ge.s32.totalorder %s27_s29, 4   ;;  %s2193_s26 = sld [smem:[#allocation23_spill]] }
 0x375   : > { %s2194_s20 = sld [smem:[#allocation21_spill]]  ;;  %s2195_s24 = smov %s1574_s25 }
 0x376   : > { %s2197_s27 = smov %s1586_s28 }
 0x377   :  { %26 = sbr.rel (!%p24_p7) target bundleno = 13 (0xd), region = 125 }
 0x379   : > { %s2196_s25 = smov %s2192_s12 }
 0x37b   : > { %s2198_s28 = smov %s2194_s20 }
 0x37c   :  { %1092 = vsyncpa [#allocation3], 1 }
 0x37d   :  { %1094 = vsyncpa [#allocation3 + $0x1], 1 }
 0x37e   :  { %1095 = vsyncpa [#allocation6], 1 }
 0x37f   :  { %1097 = vsyncpa [#allocation6 + $0x1], 1 }
 0x380   :  { %1098 = vsyncpa [#allocation9], 1 }
 0x381   :  { %1099 = vsyncpa [#allocation4], 1 }
 0x382   :  { %1101 = vsyncpa [#allocation4 + $0x1], 1 }

</bundles_post_ra>
